<compile_context>
chip_gen: v7x
topology: tpu7x:2x2x1
jax: 0.10.0
libtpu: 0.0.40
codegen_flags: <defaults>
</compile_context>

<pallas_src>
from functools import partial

import jax
import jax.numpy as jnp
from jax.experimental import pallas as pl
from jax.experimental.pallas import tpu as pltpu


def single_layer_kernel(x_ref, w_ref, b_ref, out_ref, *, H, W, Cin, Cout):
    # x_ref  : (1, Cin, H*W)        channels-first, spatial flattened into lanes
    # w_ref  : (9*Cout, Cin)        per-tap weights; row block t = ky*3 + kx
    # b_ref  : (Cout, 1)            bias column
    # out_ref: (1, Cin+Cout, H*W)   concat([x, relu(conv(x)+b)], channel axis)
    HW = H * W
    x = x_ref[0]                                              # (Cin, HW)

    # All 9 tap products in a single MXU matmul: (9*Cout, Cin) @ (Cin, HW).
    y = jnp.dot(w_ref[...].astype(jnp.float32), x.astype(jnp.float32),
                preferred_element_type=jnp.float32)           # (9*Cout, HW)

    # Column index (x coordinate) of every lane, for the left/right halo masks.
    col = jax.lax.broadcasted_iota(jnp.int32, (Cout, HW), 1) % W
    not_left = col > 0
    not_right = col < (W - 1)

    # Fold the bias into the accumulator init (broadcast over lanes).
    acc = jnp.broadcast_to(b_ref[...].astype(jnp.float32), (Cout, HW))

    # conv[co, p] = sum_t Y[t*Cout + co, p + off_t], masked at the image borders.
    # The zero-filled lane shift handles the top/bottom halo; the column masks
    # handle the left/right halo (row wrap-around in the flattened layout).
    for ky in range(3):
        for kx in range(3):
            dy, dx = ky - 1, kx - 1
            t = ky * 3 + kx
            off = dy * W + dx
            yt = y[t * Cout:(t + 1) * Cout, :]                # (Cout, HW), sublane-aligned
            if off > 0:
                shifted = jnp.concatenate(
                    [yt[:, off:], jnp.zeros((Cout, off), jnp.float32)], axis=-1)
            elif off < 0:
                shifted = jnp.concatenate(
                    [jnp.zeros((Cout, -off), jnp.float32), yt[:, :off]], axis=-1)
            else:
                shifted = yt
            if dx == -1:      # tap reads the pixel to the left  -> invalid at x == 0
                shifted = jnp.where(not_left, shifted, 0.0)
            elif dx == 1:     # tap reads the pixel to the right -> invalid at x == W-1
                shifted = jnp.where(not_right, shifted, 0.0)
            acc = acc + shifted

    conv_out = jnp.maximum(acc, 0.0)

    # Channel concat as two contiguous row-block stores (full 128-lane rows).
    out_ref[0, 0:Cin, :] = x
    out_ref[0, Cin:Cin + Cout, :] = conv_out.astype(out_ref.dtype)


def single_layer_forward(x_nchw, w_hwio, bias):
    """Equivalent of SingleLayer.forward. x_nchw: (B, Cin, H, W) -> (B, Cin+Cout, H, W)."""
    B, Cin, H, W = x_nchw.shape
    Cout = w_hwio.shape[-1]
    HW = H * W

    x_flat = x_nchw.reshape(B, Cin, HW)                       # free trailing-dim collapse
    # (3,3,Cin,Cout) -> (9*Cout, Cin): row block t = ky*3+kx holds that tap's (Cout, Cin).
    w2 = jnp.transpose(w_hwio, (0, 1, 3, 2)).reshape(9 * Cout, Cin)
    bias_col = bias.reshape(Cout, 1)

    kernel = partial(single_layer_kernel, H=H, W=W, Cin=Cin, Cout=Cout)
    out_flat = pl.pallas_call(
        kernel,
        out_shape=jax.ShapeDtypeStruct((B, Cin + Cout, HW), x_nchw.dtype),
        grid_spec=pltpu.PrefetchScalarGridSpec(
            num_scalar_prefetch=0,
            grid=(B,),
            in_specs=[
                pl.BlockSpec((1, Cin, HW), lambda b: (b, 0, 0)),
                pl.BlockSpec((9 * Cout, Cin), lambda b: (0, 0)),
                pl.BlockSpec((Cout, 1), lambda b: (0, 0)),
            ],
            out_specs=pl.BlockSpec((1, Cin + Cout, HW), lambda b: (b, 0, 0)),
        ),
        compiler_params=pltpu.CompilerParams(
            dimension_semantics=("parallel",)),
    )(x_flat, w2, bias_col)

    return out_flat.reshape(B, Cin + Cout, H, W)              # free reshape


def reference_forward(x_nchw, w_hwio, bias):
    """Pure-JAX reference (lax conv) for correctness check."""
    x_nhwc = jnp.transpose(x_nchw, (0, 2, 3, 1))
    conv = jax.lax.conv_general_dilated(
        x_nhwc, w_hwio, window_strides=(1, 1), padding="SAME",
        dimension_numbers=("NHWC", "HWIO", "NHWC"))
    out = jnp.maximum(conv + bias[None, None, None, :], 0.0)
    cat = jnp.concatenate([x_nhwc, out], axis=-1)
    return jnp.transpose(cat, (0, 3, 1, 2))


if __name__ == "__main__":
    # SingleLayer(inChannels=4, growthRate=8) at small shapes.
    B, Cin, H, W = 2, 4, 16, 16
    Cout = 8

    key = jax.random.PRNGKey(0)
    kx_, kw_, kb_ = jax.random.split(key, 3)
    x = jax.random.normal(kx_, (B, Cin, H, W), dtype=jnp.float32)
    # Deterministic synthetic parameters (same shapes as nn.Conv2d(4, 8, 3, padding=1)).
    w_hwio = 0.1 * jax.random.normal(kw_, (3, 3, Cin, Cout), dtype=jnp.float32)
    bias = 0.1 * jax.random.normal(kb_, (Cout,), dtype=jnp.float32)

    out = single_layer_forward(x, w_hwio, bias)
    out = jax.block_until_ready(out)

    ref = reference_forward(x, w_hwio, bias)
    assert out.shape == (B, Cin + Cout, H, W), out.shape
    assert jnp.allclose(out, ref, atol=1e-3, rtol=1e-3), float(
        jnp.max(jnp.abs(out - ref)))

    print("KERNEL_OK")
</pallas_src>

<mosaic_0001>
module attributes {stable_mosaic.version = 11 : i64} {
  func.func @single_layer_kernel(%arg0: i32, %arg1: memref<1x4x256xf32, #tpu.memory_space<vmem>>, %arg2: memref<72x4xf32, #tpu.memory_space<vmem>>, %arg3: memref<8x1xf32, #tpu.memory_space<vmem>>, %arg4: memref<1x12x256xf32, #tpu.memory_space<vmem>>) attributes {dimension_semantics = [#tpu.dimension_semantics<parallel>], iteration_bounds = array<i64: 2>, scalar_prefetch = 0 : i64, scratch_operands = 0 : i64, tpu.core_type = #tpu.core_type<tc>, window_params = [{transform_indices = @transform_0, window_bounds = array<i64: 1, 4, 256>}, {pipeline_mode = #tpu.pipeline_mode<synchronous>, transform_indices = @transform_1, window_bounds = array<i64: 72, 4>}, {pipeline_mode = #tpu.pipeline_mode<synchronous>, transform_indices = @transform_2, window_bounds = array<i64: 8, 1>}, {transform_indices = @transform_3, window_bounds = array<i64: 1, 12, 256>}]} {
    %c0 = arith.constant 0 : index
    %c0_0 = arith.constant 0 : index
    %c0_1 = arith.constant 0 : index
    %0 = vector.load %arg1[%c0, %c0_0, %c0_1] : memref<1x4x256xf32, #tpu.memory_space<vmem>>, vector<1x4x256xf32>
    %1 = vector.shape_cast %0 : vector<1x4x256xf32> to vector<4x256xf32>
    %c0_2 = arith.constant 0 : index
    %c0_3 = arith.constant 0 : index
    %2 = vector.load %arg2[%c0_2, %c0_3] : memref<72x4xf32, #tpu.memory_space<vmem>>, vector<72x4xf32>
    %cst = arith.constant dense<0.000000e+00> : vector<72x256xf32>
    %3 = tpu.matmul %2, %1, %cst {dimension_numbers = #tpu.dot_dimension_numbers<[1], [0], [0], [1], [0, 0, 1, 1], [], []>} : vector<72x4xf32>, vector<4x256xf32>, vector<72x256xf32> -> vector<72x256xf32>
    %4 = tpu.iota {dimensions = array<i32: 1>} : vector<8x256xi32>
    %c16_i32 = arith.constant 16 : i32
    %c0_i32 = arith.constant 0 : i32
    %5 = arith.cmpi eq, %c16_i32, %c0_i32 : i32
    %c1_i32 = arith.constant 1 : i32
    %6 = arith.select %5, %c1_i32, %c16_i32 : i32
    %7 = vector.broadcast %6 : i32 to vector<8x256xi32>
    %8 = arith.remsi %4, %7 : vector<8x256xi32>
    %c0_i32_4 = arith.constant 0 : i32
    %9 = vector.broadcast %c0_i32_4 : i32 to vector<8x256xi32>
    %10 = arith.cmpi ne, %8, %9 : vector<8x256xi32>
    %c0_i32_5 = arith.constant 0 : i32
    %11 = vector.broadcast %c0_i32_5 : i32 to vector<8x256xi32>
    %12 = arith.cmpi slt, %8, %11 : vector<8x256xi32>
    %c0_i32_6 = arith.constant 0 : i32
    %13 = arith.cmpi slt, %6, %c0_i32_6 : i32
    %14 = vector.broadcast %13 : i1 to vector<8x256xi1>
    %15 = vector.broadcast %14 : vector<8x256xi1> to vector<8x256xi1>
    %16 = arith.xori %12, %15 : vector<8x256xi1>
    %17 = arith.andi %16, %10 : vector<8x256xi1>
    %18 = vector.broadcast %6 : i32 to vector<8x256xi32>
    %19 = arith.addi %8, %18 : vector<8x256xi32>
    %20 = arith.select %17, %19, %8 : vector<8x256xi1>, vector<8x256xi32>
    %c0_i32_7 = arith.constant 0 : i32
    %21 = vector.broadcast %c0_i32_7 : i32 to vector<8x256xi32>
    %22 = arith.cmpi sgt, %20, %21 : vector<8x256xi32>
    %c15_i32 = arith.constant 15 : i32
    %23 = vector.broadcast %c15_i32 : i32 to vector<8x256xi32>
    %24 = arith.cmpi slt, %20, %23 : vector<8x256xi32>
    %c0_8 = arith.constant 0 : index
    %c0_9 = arith.constant 0 : index
    %25 = vector.load %arg3[%c0_8, %c0_9] : memref<8x1xf32, #tpu.memory_space<vmem>>, vector<8x1xf32>
    %26 = vector.shape_cast %25 : vector<8x1xf32> to vector<8x1xf32>
    %27 = vector.broadcast %26 : vector<8x1xf32> to vector<8x256xf32>
    %28 = vector.extract_strided_slice %3 {offsets = [0, 0], sizes = [8, 256], strides = [1, 1]} : vector<72x256xf32> to vector<8x256xf32>
    %cst_10 = arith.constant 0.000000e+00 : f32
    %29 = vector.broadcast %cst_10 : f32 to vector<8x17xf32>
    %30 = vector.extract_strided_slice %28 {offsets = [0, 0], sizes = [8, 239], strides = [1, 1]} : vector<8x256xf32> to vector<8x239xf32>
    %31 = tpu.concatenate %29, %30 in 1 : vector<8x17xf32>, vector<8x239xf32> -> vector<8x256xf32>
    %cst_11 = arith.constant 0.000000e+00 : f32
    %32 = vector.broadcast %cst_11 : f32 to vector<8x256xf32>
    %33 = arith.select %22, %31, %32 : vector<8x256xi1>, vector<8x256xf32>
    %34 = arith.addf %27, %33 : vector<8x256xf32>
    %35 = vector.extract_strided_slice %3 {offsets = [8, 0], sizes = [8, 256], strides = [1, 1]} : vector<72x256xf32> to vector<8x256xf32>
    %cst_12 = arith.constant 0.000000e+00 : f32
    %36 = vector.broadcast %cst_12 : f32 to vector<8x16xf32>
    %37 = vector.extract_strided_slice %35 {offsets = [0, 0], sizes = [8, 240], strides = [1, 1]} : vector<8x256xf32> to vector<8x240xf32>
    %38 = tpu.concatenate %36, %37 in 1 : vector<8x16xf32>, vector<8x240xf32> -> vector<8x256xf32>
    %39 = arith.addf %34, %38 : vector<8x256xf32>
    %40 = vector.extract_strided_slice %3 {offsets = [16, 0], sizes = [8, 256], strides = [1, 1]} : vector<72x256xf32> to vector<8x256xf32>
    %cst_13 = arith.constant 0.000000e+00 : f32
    %41 = vector.broadcast %cst_13 : f32 to vector<8x15xf32>
    %42 = vector.extract_strided_slice %40 {offsets = [0, 0], sizes = [8, 241], strides = [1, 1]} : vector<8x256xf32> to vector<8x241xf32>
    %43 = tpu.concatenate %41, %42 in 1 : vector<8x15xf32>, vector<8x241xf32> -> vector<8x256xf32>
    %cst_14 = arith.constant 0.000000e+00 : f32
    %44 = vector.broadcast %cst_14 : f32 to vector<8x256xf32>
    %45 = arith.select %24, %43, %44 : vector<8x256xi1>, vector<8x256xf32>
    %46 = arith.addf %39, %45 : vector<8x256xf32>
    %47 = vector.extract_strided_slice %3 {offsets = [24, 0], sizes = [8, 256], strides = [1, 1]} : vector<72x256xf32> to vector<8x256xf32>
    %cst_15 = arith.constant 0.000000e+00 : f32
    %48 = vector.broadcast %cst_15 : f32 to vector<8x1xf32>
    %49 = vector.extract_strided_slice %47 {offsets = [0, 0], sizes = [8, 255], strides = [1, 1]} : vector<8x256xf32> to vector<8x255xf32>
    %50 = tpu.concatenate %48, %49 in 1 : vector<8x1xf32>, vector<8x255xf32> -> vector<8x256xf32>
    %cst_16 = arith.constant 0.000000e+00 : f32
    %51 = vector.broadcast %cst_16 : f32 to vector<8x256xf32>
    %52 = arith.select %22, %50, %51 : vector<8x256xi1>, vector<8x256xf32>
    %53 = arith.addf %46, %52 : vector<8x256xf32>
    %54 = vector.extract_strided_slice %3 {offsets = [32, 0], sizes = [8, 256], strides = [1, 1]} : vector<72x256xf32> to vector<8x256xf32>
    %55 = arith.addf %53, %54 : vector<8x256xf32>
    %56 = vector.extract_strided_slice %3 {offsets = [40, 0], sizes = [8, 256], strides = [1, 1]} : vector<72x256xf32> to vector<8x256xf32>
    %57 = vector.extract_strided_slice %56 {offsets = [0, 1], sizes = [8, 255], strides = [1, 1]} : vector<8x256xf32> to vector<8x255xf32>
    %cst_17 = arith.constant 0.000000e+00 : f32
    %58 = vector.broadcast %cst_17 : f32 to vector<8x1xf32>
    %59 = tpu.concatenate %57, %58 in 1 : vector<8x255xf32>, vector<8x1xf32> -> vector<8x256xf32>
    %cst_18 = arith.constant 0.000000e+00 : f32
    %60 = vector.broadcast %cst_18 : f32 to vector<8x256xf32>
    %61 = arith.select %24, %59, %60 : vector<8x256xi1>, vector<8x256xf32>
    %62 = arith.addf %55, %61 : vector<8x256xf32>
    %63 = vector.extract_strided_slice %3 {offsets = [48, 0], sizes = [8, 256], strides = [1, 1]} : vector<72x256xf32> to vector<8x256xf32>
    %64 = vector.extract_strided_slice %63 {offsets = [0, 15], sizes = [8, 241], strides = [1, 1]} : vector<8x256xf32> to vector<8x241xf32>
    %cst_19 = arith.constant 0.000000e+00 : f32
    %65 = vector.broadcast %cst_19 : f32 to vector<8x15xf32>
    %66 = tpu.concatenate %64, %65 in 1 : vector<8x241xf32>, vector<8x15xf32> -> vector<8x256xf32>
    %cst_20 = arith.constant 0.000000e+00 : f32
    %67 = vector.broadcast %cst_20 : f32 to vector<8x256xf32>
    %68 = arith.select %22, %66, %67 : vector<8x256xi1>, vector<8x256xf32>
    %69 = arith.addf %62, %68 : vector<8x256xf32>
    %70 = vector.extract_strided_slice %3 {offsets = [56, 0], sizes = [8, 256], strides = [1, 1]} : vector<72x256xf32> to vector<8x256xf32>
    %71 = vector.extract_strided_slice %70 {offsets = [0, 16], sizes = [8, 240], strides = [1, 1]} : vector<8x256xf32> to vector<8x240xf32>
    %cst_21 = arith.constant 0.000000e+00 : f32
    %72 = vector.broadcast %cst_21 : f32 to vector<8x16xf32>
    %73 = tpu.concatenate %71, %72 in 1 : vector<8x240xf32>, vector<8x16xf32> -> vector<8x256xf32>
    %74 = arith.addf %69, %73 : vector<8x256xf32>
    %75 = vector.extract_strided_slice %3 {offsets = [64, 0], sizes = [8, 256], strides = [1, 1]} : vector<72x256xf32> to vector<8x256xf32>
    %76 = vector.extract_strided_slice %75 {offsets = [0, 17], sizes = [8, 239], strides = [1, 1]} : vector<8x256xf32> to vector<8x239xf32>
    %cst_22 = arith.constant 0.000000e+00 : f32
    %77 = vector.broadcast %cst_22 : f32 to vector<8x17xf32>
    %78 = tpu.concatenate %76, %77 in 1 : vector<8x239xf32>, vector<8x17xf32> -> vector<8x256xf32>
    %cst_23 = arith.constant 0.000000e+00 : f32
    %79 = vector.broadcast %cst_23 : f32 to vector<8x256xf32>
    %80 = arith.select %24, %78, %79 : vector<8x256xi1>, vector<8x256xf32>
    %81 = arith.addf %74, %80 : vector<8x256xf32>
    %cst_24 = arith.constant 0.000000e+00 : f32
    %82 = vector.broadcast %cst_24 : f32 to vector<8x256xf32>
    %83 = arith.maximumf %81, %82 : vector<8x256xf32>
    %c0_25 = arith.constant 0 : index
    %c0_26 = arith.constant 0 : index
    %c0_27 = arith.constant 0 : index
    %84 = vector.load %arg4[%c0_25, %c0_26, %c0_27] : memref<1x12x256xf32, #tpu.memory_space<vmem>>, vector<1x4x256xf32>
    %85 = vector.shape_cast %84 : vector<1x4x256xf32> to vector<4x256xf32>
    %86 = vector.shape_cast %1 : vector<4x256xf32> to vector<1x4x256xf32>
    tpu.vector_store %arg4[%c0_25, %c0_26, %c0_27], %86 {strides = array<i32>} : memref<1x12x256xf32, #tpu.memory_space<vmem>>, vector<1x4x256xf32>,
    %c0_28 = arith.constant 0 : index
    %c4 = arith.constant 4 : index
    %c0_29 = arith.constant 0 : index
    %87 = vector.load %arg4[%c0_28, %c4, %c0_29] : memref<1x12x256xf32, #tpu.memory_space<vmem>>, vector<1x8x256xf32>
    %88 = vector.shape_cast %87 : vector<1x8x256xf32> to vector<8x256xf32>
    %89 = vector.shape_cast %83 : vector<8x256xf32> to vector<1x8x256xf32>
    tpu.vector_store %arg4[%c0_28, %c4, %c0_29], %89 {strides = array<i32>} : memref<1x12x256xf32, #tpu.memory_space<vmem>>, vector<1x8x256xf32>,
    return
  }
  func.func @transform_0(%arg0: i32) -> (i32, i32, i32) {
    %c0_i32 = arith.constant 0 : i32
    %c0_i32_0 = arith.constant 0 : i32
    %c0_i32_1 = arith.constant 0 : i32
    return %arg0, %c0_i32, %c0_i32_0 : i32, i32, i32
  }
  func.func @transform_1(%arg0: i32) -> (i32, i32) {
    %c0_i32 = arith.constant 0 : i32
    %c0_i32_0 = arith.constant 0 : i32
    %c0_i32_1 = arith.constant 0 : i32
    return %c0_i32, %c0_i32_0 : i32, i32
  }
  func.func @transform_2(%arg0: i32) -> (i32, i32) {
    %c0_i32 = arith.constant 0 : i32
    %c0_i32_0 = arith.constant 0 : i32
    %c0_i32_1 = arith.constant 0 : i32
    return %c0_i32, %c0_i32_0 : i32, i32
  }
  func.func @transform_3(%arg0: i32) -> (i32, i32, i32) {
    %c0_i32 = arith.constant 0 : i32
    %c0_i32_0 = arith.constant 0 : i32
    %c0_i32_1 = arith.constant 0 : i32
    return %arg0, %c0_i32, %c0_i32_0 : i32, i32, i32
  }
}

</mosaic_0001>

<bundles_post_ra>
// kernel: tpu_custom_call.1
= control target key start
LH: loop header
LB: loop body
LE: loop exit
PB: predicated region body
PF: predicated region fallthrough
CT: control target
= control target key end

     0   :  { %s644_s12 = smov 0   ;;  %s752_s0 = inlined_call_operand.vmem [shape: f32[2,4,256], index: 0, kind: input, shape index: {}]   ;;  %s753_s1 = inlined_call_operand.vmem [shape: f32[72,4], index: 1, kind: input, shape index: {}]   ;;  %s754_s2 = inlined_call_operand.vmem [shape: f32[8,1], index: 2, kind: input, shape index: {}]   ;;  %s755_s3 = inlined_call_operand.vmem [shape: f32[2,12,256], index: 3, kind: output, shape index: {}]  }
   0x1 LB: > { %s560_s13 = sadd.s32 4294967295, %s612_s12   ;;  %p564_p0 = scmp.ge.s32.totalorder %s612_s12, 1  ;;  %s612_s12 = sphi %s644_s12, %s13_s12  }
   0x2   : > { %p137_p1 = scmp.lt.s32.totalorder %s612_s12, 3 }
   0x4   : > { %p138_p2 = pnand %p564_p0, %p137_p1 }
   0x5   : > { %p161_p3 = scmp.lt.s32.totalorder (!%p138_p2), %s560_s13, 1  ;;  %v614_v0 = vmov (!%p138_p2), 0.0   ;;  %v615_v1 = vmov (!%p138_p2), 0   ;;  %v366_v2 = vld [vmem:[%s754_s2] sm:$0xff] (!%p138_p2)  ;;  %vm211_vm0 = vcmask (!%p138_p2), 1043456   ;;  %vm183_vm1 = vcmask (!%p138_p2), 31744  }
   0x6   : > { %141 = sbr.rel (%p138_p2) target bundleno = 385 (0x181), region = 32  ;;  %280 = vmatprep.mubr.f32.mxu0 (!%p138_p2), %v614_v0  ;;  %310 = vmatprep.mubr.f32.mxu1 (!%p138_p2), %v614_v0  ;;  %v172_v5 = vld [vmem:[%s753_s1] sm:$0xff] (!%p138_p2)  ;;  %v177_v6 = vld [vmem:[%s753_s1 + $0x28] sm:$0xff] (!%p138_p2)  ;;  %v178_v8 = vld [vmem:[%s753_s1 + $0x30] sm:$0xff] (!%p138_p2)  ;;  %s618_s18 = smov (!%p138_p2), 16   ;;  %v335_v32 = vlaneseq (!%p138_p2)  ;;  %vm378_vm2 = vcmask (!%p138_p2), 138240  }
   0x7   : > { %604 = vset.pattern.permute.xlu0 (!%p138_p2), %v615_v1  ;;  %v173_v7 = vld [vmem:[%s753_s1 + $0x8] sm:$0xff] (!%p138_p2)  ;;  %v174_v9 = vld [vmem:[%s753_s1 + $0x10] sm:$0xff] (!%p138_p2)  ;;  %v179_v10 = vld [vmem:[%s753_s1 + $0x38] sm:$0xff] (!%p138_p2)  ;;  %s619_s19 = smov (!%p138_p2), 15   ;;  %s621_s21 = smov (!%p138_p2), 113   ;;  %vm393_vm5 = vcmask (!%p138_p2), 130048  }
   0x8   : > { %369 = vperm.xlu0 (!%p138_p2), %604, %v366_v2   ;;  %v175_v11 = vld [vmem:[%s753_s1 + $0x18] sm:$0xff] (!%p138_p2)  ;;  %v180_v12 = vld [vmem:[%s753_s1 + $0x40] sm:$0xff] (!%p138_p2)  ;;  %s622_s22 = smov (!%p138_p2), 112   ;;  %s623_s24 = smov (!%p138_p2), 111   ;;  %v336_v34 = vand.u32 (!%p138_p2), 127, %v335_v32  ;;  %vm406_vm6 = vcmask (!%p138_p2), 121856  }
   0x9   : > { %v176_v13 = vld [vmem:[%s753_s1 + $0x20] sm:$0xff] (!%p138_p2)  ;;  %vm421_vm9 = vcmask (!%p138_p2), 7168   ;;  %vm438_vm10 = vcmask (!%p138_p2), 1039360   ;;  %vm453_vm11 = vcmask (!%p138_p2), 924672   ;;  %vm468_vm12 = vcmask (!%p138_p2), 916480  }
   0xa   : > { %v337_v35 = vadd.s32 (!%p138_p2), 128, %v336_v34  ;;  %v342_v39 = vand.u32 (!%p138_p2), 15, %v336_v34  ;;  %vm481_vm13 = vcmask (!%p138_p2), 908288  }
   0xc   : > { %v349_v38 = vand.u32 (!%p138_p2), 15, %v337_v35  ;;  %vm709_vm4 = vcmp.gt.s32.totalorder (!%p138_p2), %v342_v39, 0  ;;  %vm717_vm7 = vcmp.lt.s32.totalorder (!%p138_p2), %v342_v39, 15 }
   0xd   : > { %s765_s13 = smov (!%p161_p3, %s560_s13), 1 }
   0xe   : > { %s582_s16 = sshll.u32 %s765_s13, 3  ;;  %s583_s17 = sshll.u32 %s765_s13, 5  ;;  %vm705_vm3 = vcmp.gt.s32.totalorder %v349_v38, 0  ;;  %vm721_vm8 = vcmp.lt.s32.totalorder %v349_v38, 15 }
   0xf   : > { %s165_s20 = scalar_lea.vmem %s752_s0, %s582_s16  ;;  %s661_s23 = scalar_lea.vmem %s755_s3, %s583_s17 }
  0x10   : > { %v171_v3 = vld [vmem:[%s165_s20] sm:$0xff]  ;;  %s616_s16 = smov 127   ;;  %s617_s17 = smov 17  }
  0x11   : > { %v182_v4 = vcombine.high %v171_v3, %v171_v3  ;;  %493 = vst [vmem:[%s661_s23] sm:$0xf] %v171_v3  ;;  %s620_s20 = smov 1  }
  0x13   : > { %569 = vmatprep.subr.msk.mxu0 %vm211_vm0, %v182_v4  ;;  %494 = vst [vmem:[%s661_s23 + $0x8] sm:$0xf] %v182_v4  ;;  %584 = vmatprep.subr.msk.mxu1 %vm211_vm0, %v182_v4 }
  0x14   : > { %570 = vmatpush1.msk.msra.mxu0 %vm211_vm0, %v171_v3  ;;  %585 = vmatpush1.msk.msra.mxu1 %vm211_vm0, %v171_v3 }
  0x15   : > { %571 = vmatmul.mubr.msk.f32.vlgmr.msra.gmra.mrb[0].mxu0 %vm183_vm1, %v172_v5  ;;  %576 = vmatmul.mubr.msk.f32.vlgmr.msra.gmra.mrb[0].mxu1 %vm183_vm1, %v177_v6 }
  0x16   : > { %286 = vmatprep.mubr.f32.mxu0 %v614_v0  ;;  %316 = vmatprep.mubr.f32.mxu1 %v614_v0 }
  0x19   : > { %572 = vmatmul.mubr.msk.f32.gmra.mrb[2].mxu0 %vm183_vm1, %v173_v7  ;;  %577 = vmatmul.mubr.msk.f32.gmra.mrb[2].mxu1 %vm183_vm1, %v178_v8 }
  0x1a   : > { %292 = vmatprep.mubr.f32.mxu0 %v614_v0  ;;  %322 = vmatprep.mubr.f32.mxu1 %v614_v0 }
  0x1d   : > { %573 = vmatmul.mubr.msk.f32.gmra.mrb[4].mxu0 %vm183_vm1, %v174_v9  ;;  %578 = vmatmul.mubr.msk.f32.gmra.mrb[4].mxu1 %vm183_vm1, %v179_v10 }
  0x1e   : > { %298 = vmatprep.mubr.f32.mxu0 %v614_v0  ;;  %328 = vmatprep.mubr.f32.mxu1 %v614_v0 }
  0x21   : > { %574 = vmatmul.mubr.msk.f32.gmra.mrb[6].mxu0 %vm183_vm1, %v175_v11  ;;  %579 = vmatmul.mubr.msk.f32.gmra.mrb[6].mxu1 %vm183_vm1, %v180_v12 }
  0x22   : > { %304 = vmatprep.mubr.f32.mxu0 %v614_v0 }
  0x25   : > { %575 = vmatmul.mubr.msk.f32.gmra.mrb[8].mxu0 %vm183_vm1, %v176_v13 }
  0x87   : > { %v370_v33 = vpop.permute.xlu0 %369 }
  0xe8   : > { %v282_v14 = vpop.f32.mrb[0].mxu0  ;;  %v312_v15 = vpop.f32.mrb[0].mxu1 }
  0xe9   : > { %434 = vrot.lane.b32.xlu1 %v312_v15, %s616_s16  ;;  %v314_v16 = vpop.f32.mrb[1].mxu1  ;;  %374 = vrot.lane.b32.xlu0 %v282_v14, %s617_s17  ;;  %v284_v17 = vpop.f32.mrb[1].mxu0 }
  0xec   : > { %v288_v18 = vpop.f32.mrb[2].mxu0  ;;  %v318_v19 = vpop.f32.mrb[2].mxu1 }
  0xed   : > { %436 = vrot.lane.b32.xlu0 %v314_v16, %s616_s16  ;;  %376 = vrot.lane.b32.xlu1 %v284_v17, %s617_s17  ;;  %v290_v20 = vpop.f32.mrb[3].mxu0  ;;  %v320_v21 = vpop.f32.mrb[3].mxu1 }
  0xf0   : > { %v294_v22 = vpop.f32.mrb[4].mxu0  ;;  %v324_v23 = vpop.f32.mrb[4].mxu1 }
  0xf1   : > { %389 = vrot.lane.b32.xlu1 %v288_v18, %s618_s18  ;;  %391 = vrot.lane.b32.xlu0 %v290_v20, %s618_s18  ;;  %v296_v24 = vpop.f32.mrb[5].mxu0  ;;  %v326_v25 = vpop.f32.mrb[5].mxu1 }
  0xf4   : > { %v300_v26 = vpop.f32.mrb[6].mxu0  ;;  %v330_v27 = vpop.f32.mrb[6].mxu1 }
  0xf5   : > { %402 = vrot.lane.b32.xlu1 %v294_v22, %s619_s19  ;;  %404 = vrot.lane.b32.xlu0 %v296_v24, %s619_s19  ;;  %v302_v28 = vpop.f32.mrb[7].mxu0  ;;  %v332_v29 = vpop.f32.mrb[7].mxu1 }
  0xf8   : > { %v701_v30 = vpop.f32.mrb[8].mxu0 }
  0xf9   : > { %417 = vrot.lane.b32.xlu1 %v300_v26, %s620_s20  ;;  %419 = vrot.lane.b32.xlu0 %v302_v28, %s620_s20  ;;  %v703_v31 = vpop.f32.mrb[9].mxu0 }
  0xfd   : > { %449 = vrot.lane.b32.xlu1 %v318_v19, %s621_s21  ;;  %451 = vrot.lane.b32.xlu0 %v320_v21, %s621_s21 }
 0x101   : > { %464 = vrot.lane.b32.xlu1 %v324_v23, %s622_s22  ;;  %466 = vrot.lane.b32.xlu0 %v326_v25, %s622_s22 }
 0x105   : > { %477 = vrot.lane.b32.xlu1 %v330_v27, %s623_s24  ;;  %479 = vrot.lane.b32.xlu0 %v332_v29, %s623_s24 }
 0x15b   : > { %v435_v36 = vpop.permute.xlu1 %434  ;;  %v375_v37 = vpop.permute.xlu0 %374 }
 0x15c   : > { %v382_v45 = vsel %vm378_vm2, 0.0, %v375_v37 }
 0x15d   : > { %v383_v49 = vsel %vm709_vm4, %v382_v45, 0.0 }
 0x15e   : > { %v385_v56 = vadd.f32 %v383_v49, %v370_v33 }
 0x15f   : > { %v437_v40 = vpop.permute.xlu0 %436  ;;  %v377_v41 = vpop.permute.xlu1 %376 }
 0x160   : > { %v379_v43 = vsel %vm378_vm2, %v375_v37, %v377_v41  ;;  %v439_v8 = vsel %vm438_vm10, %v435_v36, %v437_v40  ;;  %v442_v9 = vsel %vm438_vm10, %v437_v40, 0.0 }
 0x161   : > { %v384_v46 = vsel %vm705_vm3, %v379_v43, 0.0  ;;  %v443_v18 = vsel %vm717_vm7, %v439_v8, 0.0  ;;  %v444_v19 = vsel %vm721_vm8, %v442_v9, 0.0 }
 0x162   : > { %v386_v50 = vadd.f32 %v384_v46, %v370_v33 }
 0x163   : > { %v390_v47 = vpop.permute.xlu1 %389  ;;  %v392_v48 = vpop.permute.xlu0 %391 }
 0x164   : > { %v397_v52 = vsel %vm393_vm5, 0.0, %v390_v47  ;;  %v394_v53 = vsel %vm393_vm5, %v390_v47, %v392_v48 }
 0x165   : > { %v398_v62 = vadd.f32 %v397_v52, %v385_v56  ;;  %v399_v63 = vadd.f32 %v394_v53, %v386_v50 }
 0x167   : > { %v403_v54 = vpop.permute.xlu1 %402  ;;  %v405_v55 = vpop.permute.xlu0 %404 }
 0x168   : > { %v410_v58 = vsel %vm406_vm6, 0.0, %v403_v54  ;;  %v407_v59 = vsel %vm406_vm6, %v403_v54, %v405_v55 }
 0x169   : > { %v411_v60 = vsel %vm717_vm7, %v410_v58, 0.0  ;;  %v412_v61 = vsel %vm721_vm8, %v407_v59, 0.0 }
 0x16a   : > { %v413_v2 = vadd.f32 %v411_v60, %v398_v62  ;;  %v414_v3 = vadd.f32 %v412_v61, %v399_v63 }
 0x16b   : > { %v418_v0 = vpop.permute.xlu1 %417  ;;  %v420_v1 = vpop.permute.xlu0 %419 }
 0x16c   : > { %v425_v4 = vsel %vm421_vm9, 0.0, %v418_v0  ;;  %v422_v5 = vsel %vm421_vm9, %v418_v0, %v420_v1 }
 0x16d   : > { %v426_v6 = vsel %vm709_vm4, %v425_v4, 0.0  ;;  %v427_v7 = vsel %vm705_vm3, %v422_v5, 0.0 }
 0x16e   : > { %v428_v10 = vadd.f32 %v426_v6, %v413_v2  ;;  %v429_v11 = vadd.f32 %v427_v7, %v414_v3 }
 0x16f   : > { %v450_v12 = vpop.permute.xlu1 %449  ;;  %v452_v13 = vpop.permute.xlu0 %451 }
 0x170   : > { %v430_v14 = vadd.f32 %v428_v10, %v701_v30  ;;  %v454_v15 = vsel %vm453_vm11, %v450_v12, %v452_v13  ;;  %v457_v16 = vsel %vm453_vm11, %v452_v13, 0.0  ;;  %v431_v17 = vadd.f32 %v429_v11, %v703_v31 }
 0x171   : > { %v458_v22 = vsel %vm709_vm4, %v454_v15, 0.0  ;;  %v459_v23 = vsel %vm705_vm3, %v457_v16, 0.0 }
 0x172   : > { %v445_v20 = vadd.f32 %v443_v18, %v430_v14  ;;  %v446_v21 = vadd.f32 %v444_v19, %v431_v17 }
 0x173   : > { %v465_v24 = vpop.permute.xlu1 %464  ;;  %v467_v25 = vpop.permute.xlu0 %466 }
 0x174   : > { %v460_v26 = vadd.f32 %v458_v22, %v445_v20  ;;  %v461_v27 = vadd.f32 %v459_v23, %v446_v21  ;;  %v469_v28 = vsel %vm468_vm12, %v465_v24, %v467_v25  ;;  %v472_v29 = vsel %vm468_vm12, %v467_v25, 0.0 }
 0x176   : > { %v473_v32 = vadd.f32 %v469_v28, %v460_v26  ;;  %v474_v33 = vadd.f32 %v472_v29, %v461_v27 }
 0x177   : > { %v478_v30 = vpop.permute.xlu1 %477  ;;  %v480_v31 = vpop.permute.xlu0 %479 }
 0x178   : > { %v482_v34 = vsel %vm481_vm13, %v478_v30, %v480_v31  ;;  %v485_v35 = vsel %vm481_vm13, %v480_v31, 0.0 }
 0x179   : > { %v486_v36 = vsel %vm717_vm7, %v482_v34, 0.0  ;;  %v487_v37 = vsel %vm721_vm8, %v485_v35, 0.0 }
 0x17a   : > { %v488_v38 = vadd.f32 %v486_v36, %v473_v32  ;;  %v489_v39 = vadd.f32 %v487_v37, %v474_v33 }
 0x17c   : > { %v490_v40 = vmax.f32 %v488_v38, 0.0  ;;  %v491_v41 = vmax.f32 %v489_v39, 0.0 }
 0x17e   : > { %v497_v42 = vrot.slane %v490_v40, 4  ;;  %v498_v43 = vrot.slane %v491_v41, 4 }
 0x180   : > { %501 = vst [vmem:[%s661_s23 + $0x10] ss:$-12 sps:$4 sm:$0xff] %v497_v42   ;;  %502 = vst [vmem:[%s661_s23 + $0x18] ss:$-12 sps:$4 sm:$0xff] %v498_v43  }
 0x181 PF: > { %s13_s12 = sadd.s32 1, %s612_s12  }
 0x182   : > { %p10_p4 = scmp.ge.s32.totalorder %s13_s12, 4  }
 0x184   :  { %12 = sbr.rel (!%p10_p4) target bundleno = 1 (0x1), region = 62 }

</bundles_post_ra>
